<compile_context>
chip_gen: v7x
topology: tpu7x:2x2x1
jax: 0.10.0
libtpu: 0.0.40
codegen_flags: <defaults>
</compile_context>

<pallas_src>
import jax
import jax.numpy as jnp
from jax.experimental import pallas as pl
from jax.experimental.pallas import tpu as pltpu

INPUT_SIZE = 784
HIDDEN = 50
NUM_CLASSES = 10
H_PAD = 128   # hidden 50 -> 128 (one lane group; padded lanes numerically inert)


def mlp_kernel(x_ref, w1_ref, b1_ref, w2_ref, b2_ref, o_ref):
    # x streams in as f32; cast to bf16 on the VPU (hidden under the DMA) so
    # the MXU runs at native bf16 rate while accumulation stays f32.
    x = x_ref[...].astype(jnp.bfloat16)
    h = jnp.dot(x, w1_ref[...], preferred_element_type=jnp.float32)      # (tb, H_PAD)
    h = jnp.maximum(h + b1_ref[...], 0.0)                                # bias + ReLU (VPU)
    y = jnp.dot(h.astype(jnp.bfloat16), w2_ref[...],
                preferred_element_type=jnp.float32)                      # (tb, 10)
    o_ref[...] = (y + b2_ref[...]).astype(o_ref.dtype)                   # unpadded store


def prepare_params(w1, b1, w2, b2):
    """One-time pad/cast into the kernel-ready layout (hoisted out of the forward)."""
    w1_p = jnp.zeros((INPUT_SIZE, H_PAD), jnp.bfloat16).at[:, :HIDDEN].set(
        w1.astype(jnp.bfloat16))
    b1_p = jnp.zeros((1, H_PAD), jnp.float32).at[:, :HIDDEN].set(b1)
    w2_p = jnp.zeros((H_PAD, NUM_CLASSES), jnp.bfloat16).at[:HIDDEN, :].set(
        w2.astype(jnp.bfloat16))
    b2_p = b2.astype(jnp.float32).reshape(1, NUM_CLASSES)
    return w1_p, b1_p, w2_p, b2_p


def _round_up(v, m):
    return ((v + m - 1) // m) * m


def nn_forward(x, w1_p, b1_p, w2_p, b2_p, *, tile_b=1024):
    """x: (B, 784) f32 (streamed unpadded); params from prepare_params."""
    batch = x.shape[0]

    # Batch tiling: multiples of 16 (clean bf16 sublane packing) and at least
    # two grid steps when the batch allows, so both v7x TensorCores get work.
    if batch >= 32:
        tile_b = min(tile_b, _round_up(pl.cdiv(batch, 2), 16))
    tile_b = max(16, min(tile_b, _round_up(batch, 16)))
    n_tiles = pl.cdiv(batch, tile_b)

    cost = pl.CostEstimate(
        flops=2 * batch * INPUT_SIZE * H_PAD + 2 * batch * H_PAD * NUM_CLASSES,
        transcendentals=0,
        bytes_accessed=(x.size * 4 + w1_p.size * 2 + w2_p.size * 2
                        + b1_p.size * 4 + b2_p.size * 4
                        + batch * NUM_CLASSES * 4),
    )

    return pl.pallas_call(
        mlp_kernel,
        out_shape=jax.ShapeDtypeStruct((batch, NUM_CLASSES), jnp.float32),
        grid_spec=pltpu.PrefetchScalarGridSpec(
            num_scalar_prefetch=0,
            grid=(n_tiles,),
            in_specs=[
                # activation stream: unpadded f32, one batch tile per grid step
                # (last block dim == full array extent -> no explicit K padding)
                pl.BlockSpec((tile_b, INPUT_SIZE), lambda i: (i, 0)),
                # weights / biases: constant index_map -> VMEM-resident
                pl.BlockSpec((INPUT_SIZE, H_PAD), lambda i: (0, 0)),
                pl.BlockSpec((1, H_PAD), lambda i: (0, 0)),
                pl.BlockSpec((H_PAD, NUM_CLASSES), lambda i: (0, 0)),
                pl.BlockSpec((1, NUM_CLASSES), lambda i: (0, 0)),
            ],
            # unpadded (tile_b, 10) output: ~13x fewer output HBM bytes than a
            # 128-lane slab and no wrapper readback slice.
            out_specs=pl.BlockSpec((tile_b, NUM_CLASSES), lambda i: (i, 0)),
        ),
        compiler_params=pltpu.CompilerParams(
            dimension_semantics=("parallel",),   # shard batch tiles across TCs (v7x)
        ),
        cost_estimate=cost,
    )(x, w1_p, b1_p, w2_p, b2_p)


def init_params(key):
    """Deterministic init mimicking torch.nn.Linear (uniform +-1/sqrt(fan_in)),
    with weights stored transposed ((in, out)) so the kernel computes x @ W + b."""
    k1, k2, k3, k4 = jax.random.split(key, 4)
    bound1 = 1.0 / (INPUT_SIZE ** 0.5)
    bound2 = 1.0 / (HIDDEN ** 0.5)
    w1 = jax.random.uniform(k1, (INPUT_SIZE, HIDDEN), jnp.float32, -bound1, bound1)
    b1 = jax.random.uniform(k2, (1, HIDDEN), jnp.float32, -bound1, bound1)
    w2 = jax.random.uniform(k3, (HIDDEN, NUM_CLASSES), jnp.float32, -bound2, bound2)
    b2 = jax.random.uniform(k4, (1, NUM_CLASSES), jnp.float32, -bound2, bound2)
    return w1, b1, w2, b2


if __name__ == "__main__":
    key = jax.random.PRNGKey(0)
    k_x, k_p = jax.random.split(key)
    # Same shape as the reference script: x = torch.randn(64, 784)
    x = jax.random.normal(k_x, (64, INPUT_SIZE), jnp.float32)
    w1, b1, w2, b2 = init_params(k_p)
    w1_p, b1_p, w2_p, b2_p = prepare_params(w1, b1, w2, b2)   # one-time, hoisted

    out = nn_forward(x, w1_p, b1_p, w2_p, b2_p)
    out = jax.block_until_ready(out)
    assert out.shape == (64, NUM_CLASSES)

    # Reference with bf16-rounded matmul operands + f32 accumulation (kernel math).
    xb = x.astype(jnp.bfloat16).astype(jnp.float32)
    w1b = w1.astype(jnp.bfloat16).astype(jnp.float32)
    w2b = w2.astype(jnp.bfloat16).astype(jnp.float32)
    h_ref = jnp.maximum(xb @ w1b + b1, 0.0)
    ref_bf16 = h_ref.astype(jnp.bfloat16).astype(jnp.float32) @ w2b + b2
    assert jnp.allclose(out, ref_bf16, atol=1e-2, rtol=1e-2)

    # Loose sanity check against the full-f32 reference (bf16 streaming operands).
    ref_f32 = jnp.maximum(x @ w1 + b1, 0.0) @ w2 + b2
    assert jnp.allclose(out, ref_f32, atol=5e-2, rtol=5e-2)

    print("KERNEL_OK")
</pallas_src>

<mosaic_0001>
module attributes {stable_mosaic.version = 11 : i64} {
  func.func @mlp_kernel(%arg0: i32, %arg1: memref<32x784xf32, #tpu.memory_space<vmem>>, %arg2: memref<784x128xbf16, #tpu.memory_space<vmem>>, %arg3: memref<1x128xf32, #tpu.memory_space<vmem>>, %arg4: memref<128x10xbf16, #tpu.memory_space<vmem>>, %arg5: memref<1x10xf32, #tpu.memory_space<vmem>>, %arg6: memref<32x10xf32, #tpu.memory_space<vmem>>) attributes {dimension_semantics = [#tpu.dimension_semantics<parallel>], iteration_bounds = array<i64: 2>, scalar_prefetch = 0 : i64, scratch_operands = 0 : i64, tpu.core_type = #tpu.core_type<tc>, window_params = [{transform_indices = @transform_0, window_bounds = array<i64: 32, 784>}, {pipeline_mode = #tpu.pipeline_mode<synchronous>, transform_indices = @transform_1, window_bounds = array<i64: 784, 128>}, {pipeline_mode = #tpu.pipeline_mode<synchronous>, transform_indices = @transform_2, window_bounds = array<i64: 1, 128>}, {pipeline_mode = #tpu.pipeline_mode<synchronous>, transform_indices = @transform_3, window_bounds = array<i64: 128, 10>}, {pipeline_mode = #tpu.pipeline_mode<synchronous>, transform_indices = @transform_4, window_bounds = array<i64: 1, 10>}, {transform_indices = @transform_5, window_bounds = array<i64: 32, 10>}]} {
    %c0 = arith.constant 0 : index
    %c0_0 = arith.constant 0 : index
    %0 = vector.load %arg1[%c0, %c0_0] : memref<32x784xf32, #tpu.memory_space<vmem>>, vector<32x784xf32>
    %1 = arith.truncf %0 : vector<32x784xf32> to vector<32x784xbf16>
    %c0_1 = arith.constant 0 : index
    %c0_2 = arith.constant 0 : index
    %2 = vector.load %arg2[%c0_1, %c0_2] : memref<784x128xbf16, #tpu.memory_space<vmem>>, vector<784x128xbf16>
    %cst = arith.constant dense<0.000000e+00> : vector<32x128xf32>
    %3 = tpu.matmul %1, %2, %cst {dimension_numbers = #tpu.dot_dimension_numbers<[1], [0], [0], [1], [0, 0, 1, 1], [], []>} : vector<32x784xbf16>, vector<784x128xbf16>, vector<32x128xf32> -> vector<32x128xf32>
    %c0_3 = arith.constant 0 : index
    %c0_4 = arith.constant 0 : index
    %4 = vector.load %arg3[%c0_3, %c0_4] : memref<1x128xf32, #tpu.memory_space<vmem>>, vector<1x128xf32>
    %5 = vector.broadcast %4 : vector<1x128xf32> to vector<32x128xf32>
    %6 = arith.addf %3, %5 : vector<32x128xf32>
    %cst_5 = arith.constant 0.000000e+00 : f32
    %7 = vector.broadcast %cst_5 : f32 to vector<32x128xf32>
    %8 = arith.maximumf %6, %7 : vector<32x128xf32>
    %9 = arith.truncf %8 : vector<32x128xf32> to vector<32x128xbf16>
    %c0_6 = arith.constant 0 : index
    %c0_7 = arith.constant 0 : index
    %10 = vector.load %arg4[%c0_6, %c0_7] : memref<128x10xbf16, #tpu.memory_space<vmem>>, vector<128x10xbf16>
    %cst_8 = arith.constant dense<0.000000e+00> : vector<32x10xf32>
    %11 = tpu.matmul %9, %10, %cst_8 {dimension_numbers = #tpu.dot_dimension_numbers<[1], [0], [0], [1], [0, 0, 1, 1], [], []>} : vector<32x128xbf16>, vector<128x10xbf16>, vector<32x10xf32> -> vector<32x10xf32>
    %c0_9 = arith.constant 0 : index
    %c0_10 = arith.constant 0 : index
    %12 = vector.load %arg5[%c0_9, %c0_10] : memref<1x10xf32, #tpu.memory_space<vmem>>, vector<1x10xf32>
    %13 = vector.broadcast %12 : vector<1x10xf32> to vector<32x10xf32>
    %14 = arith.addf %11, %13 : vector<32x10xf32>
    %c0_11 = arith.constant 0 : index
    %c0_12 = arith.constant 0 : index
    %15 = vector.load %arg6[%c0_11, %c0_12] : memref<32x10xf32, #tpu.memory_space<vmem>>, vector<32x10xf32>
    tpu.vector_store %arg6[%c0_11, %c0_12], %14 {strides = array<i32>} : memref<32x10xf32, #tpu.memory_space<vmem>>, vector<32x10xf32>,
    return
  }
  func.func @transform_0(%arg0: i32) -> (i32, i32) {
    %c0_i32 = arith.constant 0 : i32
    %c0_i32_0 = arith.constant 0 : i32
    return %arg0, %c0_i32 : i32, i32
  }
  func.func @transform_1(%arg0: i32) -> (i32, i32) {
    %c0_i32 = arith.constant 0 : i32
    %c0_i32_0 = arith.constant 0 : i32
    %c0_i32_1 = arith.constant 0 : i32
    return %c0_i32, %c0_i32_0 : i32, i32
  }
  func.func @transform_2(%arg0: i32) -> (i32, i32) {
    %c0_i32 = arith.constant 0 : i32
    %c0_i32_0 = arith.constant 0 : i32
    %c0_i32_1 = arith.constant 0 : i32
    return %c0_i32, %c0_i32_0 : i32, i32
  }
  func.func @transform_3(%arg0: i32) -> (i32, i32) {
    %c0_i32 = arith.constant 0 : i32
    %c0_i32_0 = arith.constant 0 : i32
    %c0_i32_1 = arith.constant 0 : i32
    return %c0_i32, %c0_i32_0 : i32, i32
  }
  func.func @transform_4(%arg0: i32) -> (i32, i32) {
    %c0_i32 = arith.constant 0 : i32
    %c0_i32_0 = arith.constant 0 : i32
    %c0_i32_1 = arith.constant 0 : i32
    return %c0_i32, %c0_i32_0 : i32, i32
  }
  func.func @transform_5(%arg0: i32) -> (i32, i32) {
    %c0_i32 = arith.constant 0 : i32
    %c0_i32_0 = arith.constant 0 : i32
    return %arg0, %c0_i32 : i32, i32
  }
}

</mosaic_0001>

<bundles_post_ra>
// kernel: tpu_custom_call.1
= control target key start
LH: loop header
LB: loop body
LE: loop exit
PB: predicated region body
PF: predicated region fallthrough
CT: control target
= control target key end

     0   :  { %10 = vsyncpa [#allocation3], 0  ;;  %s1767_s0 = inlined_call_operand.hbm [shape: f32[64,784], index: 0, kind: input, shape index: {}]   ;;  %s1768_s1 = inlined_call_operand.hbm [shape: bf16[784,128], index: 1, kind: input, shape index: {}]   ;;  %s1769_s2 = inlined_call_operand.vmem [shape: f32[1,128], index: 2, kind: input, shape index: {}]   ;;  %s1770_s3 = inlined_call_operand.vmem [shape: bf16[128,10], index: 3, kind: input, shape index: {}]   ;;  %s1771_s4 = inlined_call_operand.vmem [shape: f32[1,10], index: 4, kind: input, shape index: {}]   ;;  %s1772_s5 = inlined_call_operand.vmem [shape: f32[64,10], index: 5, kind: output, shape index: {}]  }
   0x1   :  { %12 = vsyncpa [#allocation3 + $0x1], 0 }
   0x2   :  { %13 = vsyncpa [#allocation5], 0  ;;  %s1562_s18 = smov 0   ;;  %s1564_s19 = smov 0  }
   0x3   :  { %s1566_s20 = smov 0   ;;  %s1568_s21 = smov 0  }
   0x4 LB: > { %s1116_s22 = sadd.s32 4294967295, %s1524_s21   ;;  %p39_p0 = scmp.ne.s32.totalorder %s1516_s19, %s1512_s18  ;;  %s1524_s21 = sphi %s1568_s21, %s1788_s21   ;;  %s1520_s20 = sphi %s1566_s20, %s1787_s20   ;;  %s1516_s19 = sphi %s1564_s19, %s1786_s19   ;;  %s1512_s18 = sphi %s1562_s18, %s1785_s18  }
   0x5   : > { %p1584_p1 = scmp.eq.s32.totalorder %s1116_s22, 0  ;;  %p1118_p2 = scmp.ge.s32.totalorder %s1524_s21, 1 }
   0x6   : > { %p160_p3 = scmp.lt.s32.totalorder %s1524_s21, 3  ;;  %s1526_s26 = smov [#allocation4]  }
   0x7   : > { %s1777_s23 = scalar_select %p1584_p1, 1, 0 }
   0x8   : > { %p1592_p4 = por %p1584_p1, %p39_p0  ;;  %p1596_p5 = pnand %p1118_p2, %p160_p3 }
   0x9   : > { %s172_s27 = sshll.u32 %s1526_s26, 4  ;;  %s1609_s29 = sadd.s32 1, %s1524_s21   ;;  %s173_s27 = int_to_ptr.vmem [resolvable:$true] %s172_s27 }
   0xa   : > { %s1778_s24 = scalar_select %p1592_p4, 1, 0 }
   0xb   : > { %s1779_s25 = scalar_select %p1596_p5, 1, 0 }
   0xc   : > { %p1323_p6 = pneg %p1596_p5  ;;  %s26_s30 = sadd.s32 1, %s1520_s20 }
   0xd   : > { %s23_s6 = ssub.s32 %s1524_s21, %s1609_s29  ;;  %s1428_s9 = scalar_lea.hbm %s1768_s1, 6272 }
   0xe   : > { %p1604_p7 = pnand %p1323_p6, %p1584_p1  ;;  %p1429_p8 = scmp.ne.s32.totalorder %s1768_s1, %s1428_s9 }
   0xf   : > { %p1435_p12 = scmp.lt.u32.totalorder %s1428_s9, %s1768_s1 }
  0x10   : > { %p1430_p9 = pneg %p1604_p7 }
  0x12   : > { %p1431_p10 = pnand %p1430_p9, %p1429_p8 }
  0x14   : > { %p1432_p11 = pneg %p1431_p10 }
  0x16   : > { %p1437_p13 = pnand %p1435_p12, %p1432_p11 }
  0x18   : > { %1440 = shalt.err (!%p1437_p13)
}
  0x19   : > { %s1441_s14 = scalar_lea.vmem %s173_s27, 6272  ;;  %p1449_p6 = scmp.lt.s32.totalorder %s173_s27, %s173_s27 }
  0x1a   : > { %p1442_p0 = scmp.ne.s32.totalorder %s173_s27, %s1441_s14  ;;  %p1450_p1 = scmp.lt.s32.totalorder %s1441_s14, %s1441_s14 }
  0x1c   : > { %p1444_p2 = pnand %p1442_p0, %p1430_p9  ;;  %p1451_p4 = por %p1450_p1, %p1449_p6 }
  0x1e   : > { %p1445_p3 = pneg %p1444_p2 }
  0x20   : > { %p1452_p5 = pnand %p1451_p4, %p1445_p3 }
  0x22   : > { %1455 = shalt.err (!%p1452_p5)
}
  0x23   : > { %s1527_s15 = smov 64   ;;  %s1528_s16 = smov 4  }
  0x24   : > { %1326 = dma.hbm_to_vmem [thread:$0]  (!%p1604_p7), %s1768_s1, 6272, %s173_s27, [#allocation5], %s1527_s15, %s1527_s15, %s1528_s16  }
  0x25   : > { %p24_p8 = scmp.eq.s32.totalorder %s23_s6, 0  ;;  %p33_p9 = scmp.ne.s32.totalorder %s1520_s20, %s1516_s19 }
  0x26   : > { %p34_p1 = scmp.eq.s32.totalorder %s1524_s21, 0  ;;  %p1332_p4 = scmp.lt.s32.totalorder %s1524_s21, 2 }
  0x27   : > { %s1635_s26 = scalar_select %p24_p8, %s1520_s20, %s26_s30  }
  0x28   : > { %p35_p5 = por %p34_p1, %p33_p9  ;;  %s195_s7 = sand.u32 1, %s1520_s20  }
  0x29   : > { %s1314_s8 = smul.u32 224, %s195_s7  ;;  %s1650_s12 = scalar_lea.sflag [#allocation3], %s195_s7 }
  0x2a   : > { %s1315_s9 = smul.u32 3584, %s1524_s21  ;;  %p1639_p10 = pnand %p1332_p4, %p35_p5 }
  0x2b   : > { %s199_s30 = scalar_lea.vmem [#allocation2], %s1314_s8  ;;  %s1461_s16 = scalar_lea.hbm %s1767_s0, 7168 }
  0x2c   : > { %s1646_s27 = scalar_lea.hbm %s1767_s0, %s1315_s9  ;;  %s207_s6 = sshll.u32 %s199_s30, 4  ;;  %s1648_s6 = int_to_ptr.vmem [resolvable:$true] %s207_s6 }
  0x2d   : > { %s1456_s13 = scalar_lea.hbm %s1646_s27, 3584  ;;  %p1458_p11 = pneg %p1639_p10 }
  0x2e   : > { %p1457_p7 = scmp.ne.s32.totalorder %s1646_s27, %s1456_s13  ;;  %p1462_p0 = scmp.lt.u32.totalorder %s1646_s27, %s1767_s0 }
  0x2f   : > { %p1463_p2 = scmp.lt.u32.totalorder %s1461_s16, %s1456_s13  ;;  %p1465_p6 = scmp.lt.u32.totalorder %s1456_s13, %s1646_s27 }
  0x30   : > { %p1459_p12 = pnand %p1458_p11, %p1457_p7 }
  0x31   : > { %p1464_p3 = por %p1463_p2, %p1462_p0 }
  0x32   : > { %p1460_p13 = pneg %p1459_p12 }
  0x33   : > { %p1466_p8 = por %p1465_p6, %p1464_p3 }
  0x35   : > { %p1467_p9 = pnand %p1466_p8, %p1460_p13 }
  0x37   : > { %1470 = shalt.err (!%p1467_p9)
}
  0x38   : > { %s1471_s7 = scalar_lea.vmem %s1648_s6, 3584  ;;  %s1529_s8 = smov [#allocation2]  }
  0x39   : > { %p1472_p1 = scmp.ne.s32.totalorder %s1648_s6, %s1471_s7  ;;  %s1476_s9 = sshll.u32 %s1529_s8, 4  ;;  %s1477_s9 = int_to_ptr.vmem [resolvable:$false] %s1476_s9 }
  0x3a   : > { %s1478_s11 = scalar_lea.vmem %s1477_s9, 7168  ;;  %p1479_p7 = scmp.lt.s32.totalorder %s1648_s6, %s1477_s9 }
  0x3b   : > { %p1474_p4 = pnand %p1472_p1, %p1458_p11  ;;  %p1480_p12 = scmp.lt.s32.totalorder %s1478_s11, %s1471_s7 }
  0x3d   : > { %p1475_p5 = pneg %p1474_p4  ;;  %p1481_p0 = por %p1480_p12, %p1479_p7 }
  0x3f   : > { %p1482_p2 = pnand %p1481_p0, %p1475_p5 }
  0x41   : > { %1485 = shalt.err (!%p1482_p2)
}
  0x42   : > { %s1530_s28 = smov 896   ;;  %s1531_s30 = smov 56  }
  0x43   : > { %1330 = dma.hbm_to_vmem [thread:$0]  (!%p1639_p10), %s1646_s27, 3584, %s1648_s6, %s1650_s12, %s1530_s28, %s1530_s28, %s1531_s30  }
  0x44   : > { %p1782_p11 = scmp.ne.s32.totalorder %s1779_s25, 0 }
  0x45   : > { %s221_s13 = sand.u32 (!%p1782_p11), 1, %s1516_s19   ;;  %p1783_p13 = scmp.ne.s32.totalorder (!%p1782_p11), %s1778_s24, 0 }
  0x46   : > { %219 = sbr.rel (%p1782_p11) target bundleno = 597 (0x255), region = 40  ;;  %s222_s15 = scalar_lea.sflag (!%p1782_p11), [#allocation3], %s221_s13 }
  0x47   : > { %s1316_s14 = smul.u32 (!%p1782_p11), 224, %s221_s13 }
  0x49   : > { %s1681_s16 = scalar_lea.vmem (!%p1782_p11), [#allocation2], %s1316_s14 }
  0x4d   : > { %1503 = dma.done.wait (%p1783_p13), %s222_s15, 3584  }
  0x4e   : > { %1505 = vsyncadd (%p1783_p13), %s222_s15, 4294963712  ;;  %p1784_p3 = scmp.ne.s32.totalorder %s1777_s23, 0 }
  0x50   : > { %1507 = dma.done.wait (%p1784_p3), [#allocation5], 6272  }
  0x51   : > { %1509 = vsyncadd (%p1784_p3), [#allocation5], 4294961024  ;;  %v1371_v0 = vld [vmem:[#allocation4 + $0x40] sm:$0xff]   ;;  %v1375_v4 = vld [vmem:[#allocation4 + $0x48] sm:$0xff]   ;;  %vm705_vm0 = vcmask 130048   ;;  %vm1034_vm1 = vcmask 80896  }
  0x52   : > { %v1372_v1 = vld [vmem:[#allocation4] sm:$0xff]   ;;  %1191 = vmatprep.subr.bf16.mxu0 %v1371_v0  ;;  %v1376_v5 = vld [vmem:[#allocation4 + $0x8] sm:$0xff]   ;;  %v1379_v8 = vld [vmem:[#allocation4 + $0x50] sm:$0xff]  }
  0x53   : > { %v1373_v2 = vld [vmem:[#allocation4 + $0xc0] sm:$0xff]   ;;  %1192 = vmatpush3.bf16.msra.mxu0 %v1372_v1  ;;  %v1377_v6 = vld [vmem:[#allocation4 + $0xc8] sm:$0xff]   ;;  %v1380_v9 = vld [vmem:[#allocation4 + $0x10] sm:$0xff]  }
  0x54   : > { %v1374_v3 = vld [vmem:[#allocation4 + $0x80] sm:$0xff]   ;;  %1219 = vmatprep.subr.bf16.mxu1 %v1373_v2  ;;  %1193 = vmatprep.subr.bf16.mxu0 %v1375_v4  ;;  %v1378_v7 = vld [vmem:[#allocation4 + $0x88] sm:$0xff]   ;;  %v1381_v10 = vld [vmem:[#allocation4 + $0xd0] sm:$0xff]  }
  0x55   : > { %1220 = vmatpush3.bf16.msra.mxu1 %v1374_v3  ;;  %v1382_v11 = vld [vmem:[#allocation4 + $0x90] sm:$0xff]   ;;  %v1383_v12 = vld [vmem:[#allocation4 + $0x58] sm:$0xff]   ;;  %v1387_v16 = vld [vmem:[#allocation4 + $0x60] sm:$0xff]  }
  0x56   : > { %1221 = vmatprep.subr.bf16.mxu1 %v1377_v6  ;;  %v1384_v13 = vld [vmem:[#allocation4 + $0x18] sm:$0xff]   ;;  %v1388_v17 = vld [vmem:[#allocation4 + $0x20] sm:$0xff]   ;;  %v1391_v20 = vld [vmem:[#allocation4 + $0x68] sm:$0xff]  }
  0x57   : > { %1194 = vmatpush3.bf16.msra.mxu0 %v1376_v5  ;;  %v1385_v14 = vld [vmem:[#allocation4 + $0xd8] sm:$0xff]   ;;  %v1389_v18 = vld [vmem:[#allocation4 + $0xe0] sm:$0xff]   ;;  %v1392_v21 = vld [vmem:[#allocation4 + $0x28] sm:$0xff]  }
  0x58   : > { %1195 = vmatprep.subr.bf16.mxu0 %v1379_v8  ;;  %v1386_v15 = vld [vmem:[#allocation4 + $0x98] sm:$0xff]   ;;  %v1390_v19 = vld [vmem:[#allocation4 + $0xa0] sm:$0xff]   ;;  %v1393_v22 = vld [vmem:[#allocation4 + $0xe8] sm:$0xff]  }
  0x59   : > { %1222 = vmatpush3.bf16.msra.mxu1 %v1378_v7  ;;  %v1394_v23 = vld [vmem:[#allocation4 + $0xa8] sm:$0xff]   ;;  %v1395_v24 = vld [vmem:[#allocation4 + $0x70] sm:$0xff]   ;;  %v1399_v28 = vld [vmem:[#allocation4 + $0x78] sm:$0xff]  }
  0x5a   : > { %1223 = vmatprep.subr.bf16.mxu1 %v1381_v10  ;;  %v1396_v25 = vld [vmem:[#allocation4 + $0x30] sm:$0xff]   ;;  %v1400_v29 = vld [vmem:[#allocation4 + $0x38] sm:$0xff]   ;;  %v265_v31 = vld [vmem:[%s1681_s16 + $0x8] sm:$0xff] }
  0x5b   : > { %1196 = vmatpush3.bf16.msra.mxu0 %v1380_v9  ;;  %v1397_v26 = vld [vmem:[#allocation4 + $0xf0] sm:$0xff]   ;;  %v1401_v30 = vld [vmem:[#allocation4 + $0xf8] sm:$0xff]   ;;  %v272_v32 = vld [vmem:[%s1681_s16 + $0x40] sm:$0xff] }
  0x5c   : > { %1197 = vmatprep.subr.bf16.mxu0 %v1383_v12  ;;  %v1398_v27 = vld [vmem:[#allocation4 + $0xb0] sm:$0xff]   ;;  %v293_v33 = vpack.c.bf16 %v272_v32, %v265_v31  ;;  %v1402_v34 = vld [vmem:[#allocation4 + $0xb8] sm:$0xff]   ;;  %v264_v35 = vld [vmem:[%s1681_s16] sm:$0xff] }
  0x5d   : > { %1224 = vmatpush3.bf16.msra.mxu1 %v1382_v11  ;;  %v271_v36 = vld [vmem:[%s1681_s16 + $0x38] sm:$0xff]  ;;  %v1403_v38 = vld [vmem:[#allocation4 + $0x140] sm:$0xff]   ;;  %v274_v40 = vld [vmem:[%s1681_s16 + $0x50] sm:$0xff] }
  0x5e   : > { %1225 = vmatprep.subr.bf16.mxu1 %v1385_v14  ;;  %744 = vmatprep.mubr.bf16.mxu0 %v293_v33  ;;  %v292_v37 = vpack.c.bf16 %v271_v36, %v264_v35  ;;  %v267_v39 = vld [vmem:[%s1681_s16 + $0x18] sm:$0xff]  ;;  %v1404_v42 = vld [vmem:[#allocation4 + $0x100] sm:$0xff]   ;;  %v266_v43 = vld [vmem:[%s1681_s16 + $0x10] sm:$0xff] }
  0x5f   : > { %1198 = vmatpush3.bf16.msra.mxu0 %v1384_v13  ;;  %v295_v41 = vpack.c.bf16 %v274_v40, %v267_v39  ;;  %v273_v44 = vld [vmem:[%s1681_s16 + $0x48] sm:$0xff]  ;;  %v1407_v48 = vld [vmem:[#allocation4 + $0x150] sm:$0xff]   ;;  %v1409_v50 = vld [vmem:[#allocation4 + $0x158] sm:$0xff]  }
  0x60   : > { %1199 = vmatprep.subr.bf16.mxu0 %v1387_v16  ;;  %v294_v45 = vpack.c.bf16 %v273_v44, %v266_v43  ;;  %v1405_v46 = vld [vmem:[#allocation4 + $0x148] sm:$0xff]   ;;  %v1408_v49 = vld [vmem:[#allocation4 + $0x110] sm:$0xff]   ;;  %v1410_v51 = vld [vmem:[#allocation4 + $0x118] sm:$0xff]  }
  0x61   : > { %1226 = vmatpush3.bf16.msra.mxu1 %v1386_v15  ;;  %793 = vmatprep.mubr.bf16.mxu1 %v295_v41  ;;  %v1406_v47 = vld [vmem:[#allocation4 + $0x108] sm:$0xff]   ;;  %v279_v52 = vld [vmem:[%s1681_s16 + $0x78] sm:$0xff]  ;;  %v286_v53 = vld [vmem:[%s1681_s16 + $0xb0] sm:$0xff] }
  0x62   : > { %1227 = vmatprep.subr.bf16.mxu1 %v1389_v18  ;;  %v1411_v54 = vld [vmem:[#allocation4 + $0x160] sm:$0xff]   ;;  %v300_v55 = vpack.c.bf16 %v286_v53, %v279_v52  ;;  %v278_v56 = vld [vmem:[%s1681_s16 + $0x70] sm:$0xff]  ;;  %v285_v57 = vld [vmem:[%s1681_s16 + $0xa8] sm:$0xff] }
  0x63   : > { %1200 = vmatpush3.bf16.msra.mxu0 %v1388_v17  ;;  %v1412_v58 = vld [vmem:[#allocation4 + $0x120] sm:$0xff]   ;;  %v299_v59 = vpack.c.bf16 %v285_v57, %v278_v56  ;;  %v281_v60 = vld [vmem:[%s1681_s16 + $0x88] sm:$0xff]  ;;  %v287_v0 = vld [vmem:[%s1681_s16 + $0xb8] sm:$0xff] }
  0x64   : > { %1201 = vmatprep.subr.bf16.mxu0 %v1391_v20  ;;  %v288_v61 = vld [vmem:[%s1681_s16 + $0xc0] sm:$0xff]  ;;  %v1413_v1 = vld [vmem:[#allocation4 + $0x168] sm:$0xff]   ;;  %v1415_v5 = vld [vmem:[#allocation4 + $0x170] sm:$0xff]  }
  0x65   : > { %1228 = vmatpush3.bf16.msra.mxu1 %v1390_v19  ;;  %v280_v62 = vld [vmem:[%s1681_s16 + $0x80] sm:$0xff]  ;;  %v302_v63 = vpack.c.bf16 %v288_v61, %v281_v60  ;;  %v1414_v4 = vld [vmem:[#allocation4 + $0x128] sm:$0xff]   ;;  %v270_v9 = vld [vmem:[%s1681_s16 + $0x30] sm:$0xff] }
  0x66   : > { %1229 = vmatprep.subr.bf16.mxu1 %v1393_v22  ;;  %v301_v2 = vpack.c.bf16 %v287_v0, %v280_v62  ;;  %v1417_v3 = vld [vmem:[#allocation4 + $0x180] sm:$0xff]   ;;  %v269_v6 = vld [vmem:[%s1681_s16 + $0x28] sm:$0xff]  ;;  %v291_v12 = vld [vmem:[%s1681_s16 + $0xd8] sm:$0xff] }
  0x67   : > { %1202 = vmatpush3.bf16.msra.mxu0 %v1392_v21  ;;  %v276_v7 = vld [vmem:[%s1681_s16 + $0x60] sm:$0xff]  ;;  %v277_v10 = vld [vmem:[%s1681_s16 + $0x68] sm:$0xff]  ;;  %v1416_v13 = vld [vmem:[#allocation4 + $0x130] sm:$0xff]  }
  0x68   : > { %1203 = vmatprep.subr.bf16.mxu0 %v1395_v24  ;;  %v297_v8 = vpack.c.bf16 %v276_v7, %v269_v6  ;;  %v284_v11 = vld [vmem:[%s1681_s16 + $0xa0] sm:$0xff]  ;;  %v298_v14 = vpack.c.bf16 %v277_v10, %v270_v9  ;;  %v1418_v16 = vld [vmem:[#allocation4 + $0x178] sm:$0xff]   ;;  %v290_v21 = vld [vmem:[%s1681_s16 + $0xd0] sm:$0xff] }
  0x69   : > { %1230 = vmatpush3.bf16.msra.mxu1 %v1394_v23  ;;  %v305_v15 = vpack.c.bf16 %v291_v12, %v284_v11  ;;  %v1419_v17 = vld [vmem:[#allocation4 + $0x138] sm:$0xff]   ;;  %v268_v18 = vld [vmem:[%s1681_s16 + $0x20] sm:$0xff]  ;;  %v282_v24 = vld [vmem:[%s1681_s16 + $0x90] sm:$0xff] }
  0x6a   : > { %1231 = vmatprep.subr.bf16.mxu1 %v1397_v26  ;;  %v275_v19 = vld [vmem:[%s1681_s16 + $0x58] sm:$0xff]  ;;  %v1424_v31 = vld [vmem:[%s1770_s3 + $0x20] sm:$0xff]   ;;  %v1425_v32 = vld [vmem:[%s1770_s3 + $0x28] sm:$0xff]  }
  0x6b   : > { %1204 = vmatpush3.bf16.msra.mxu0 %v1396_v25  ;;  %v283_v20 = vld [vmem:[%s1681_s16 + $0x98] sm:$0xff]  ;;  %v296_v22 = vpack.c.bf16 %v275_v19, %v268_v18  ;;  %v289_v25 = vld [vmem:[%s1681_s16 + $0xc8] sm:$0xff]  ;;  %v1426_v33 = vld [vmem:[%s1770_s3 + $0x30] sm:$0xff]   ;;  %s1126_s16 = sshll.u32 %s1116_s22, 2 }
  0x6c   : > { %1205 = vmatprep.subr.bf16.mxu0 %v1399_v28  ;;  %v304_v23 = vpack.c.bf16 %v290_v21, %v283_v20  ;;  %v303_v26 = vpack.c.bf16 %v289_v25, %v282_v24  ;;  %v1421_v28 = vld [vmem:[%s1770_s3 + $0x8] sm:$0xff]   ;;  %v1128_v36 = vld [vmem:[%s1769_s2] ss:$0 sm:$0xff]  ;;  %p258_p10 = scmp.lt.s32.totalorder %s1126_s16, 7 }
  0x6d   : > { %1232 = vmatpush3.bf16.msra.mxu1 %v1398_v27  ;;  %v1420_v27 = vld [vmem:[%s1770_s3] sm:$0xff]  }
  0x6e   : > { %1233 = vmatprep.subr.bf16.mxu1 %v1401_v30  ;;  %v1423_v30 = vld [vmem:[%s1770_s3 + $0x18] sm:$0xff]   ;;  %s1790_s16 = smov (!%p258_p10, %s1126_s16), 7 }
  0x6f   : > { %1206 = vmatpush3.bf16.msra.mxu0 %v1400_v29  ;;  %v1422_v29 = vld [vmem:[%s1770_s3 + $0x10] sm:$0xff]   ;;  %s1127_s23 = sshll.u32 %s1790_s16, 3 }
  0x70   : > { %1247 = vmatprep.subr.bf16.mxu0 %v1403_v38  ;;  %s261_s6 = scalar_lea.vmem %s1772_s5, %s1127_s23 }
  0x71   : > { %1234 = vmatpush3.bf16.msra.mxu1 %v1402_v34  ;;  %v1427_v34 = vld [vmem:[%s1770_s3 + $0x38] sm:$0xff]  }
  0x72   : > { %745 = vmatmul.mubr.bf16.vlgmr.msra.gmra.mrb[0].mxu0 %v292_v37  ;;  %1288 = vmatprep.subr.bf16.mxu1 %v1417_v3 }
  0x73   : > { %1248 = vmatpush3.bf16.msra.mxu0 %v1404_v42  ;;  %752 = vmatprep.mubr.bf16.mxu0 %v300_v55 }
  0x74   : > { %794 = vmatmul.mubr.bf16.vlgmr.msra.gmra.mrb[0].mxu1 %v294_v45  ;;  %1249 = vmatprep.subr.bf16.mxu0 %v1405_v46 }
  0x75   : > { %801 = vmatprep.mubr.bf16.mxu1 %v302_v63  ;;  %1289 = vmatpush3.bf16.msra.mxu1 %v1417_v3 }
  0x76   : > { %1294 = vmatprep.subr.bf16.mxu1 %v1420_v27 }
  0x77   : > { %1250 = vmatpush3.bf16.msra.mxu0 %v1406_v47 }
  0x78   : > { %1251 = vmatprep.subr.bf16.mxu0 %v1407_v48 }
  0x7a   : > { %753 = vmatmul.mubr.bf16.gmra.mrb[4].mxu0 %v299_v59 }
  0x7b   : > { %1252 = vmatpush3.bf16.msra.mxu0 %v1408_v49  ;;  %842 = vmatprep.mubr.bf16.mxu0 %v297_v8 }
  0x7c   : > { %1253 = vmatprep.subr.bf16.mxu0 %v1409_v50  ;;  %802 = vmatmul.mubr.bf16.gmra.mrb[4].mxu1 %v301_v2 }
  0x7d   : > { %1290 = vmatprep.mubr.msk.bf16.mxu1 %vm705_vm0, %v298_v14 }
  0x7f   : > { %1254 = vmatpush3.bf16.msra.mxu0 %v1410_v51 }
  0x80   : > { %1255 = vmatprep.subr.bf16.mxu0 %v1411_v54 }
  0x83   : > { %1256 = vmatpush3.bf16.msra.mxu0 %v1412_v58 }
  0x84   : > { %1257 = vmatprep.subr.bf16.mxu0 %v1413_v1  ;;  %1291 = vmatmul.mubr.msk.bf16.vlgmr.msra.gmra.mrb[8].mxu1 %vm705_vm0, %v305_v15 }
  0x85   : > { %1295 = vmatpush3.bf16.msra.mxu1 %v1420_v27 }
  0x86   : > { %1296 = vmatprep.subr.bf16.mxu1 %v1421_v28 }
  0x87   : > { %1258 = vmatpush3.bf16.msra.mxu0 %v1414_v4 }
  0x88   : > { %1259 = vmatprep.subr.bf16.mxu0 %v1415_v5 }
  0x89   : > { %1297 = vmatpush3.bf16.msra.mxu1 %v1421_v28 }
  0x8a   : > { %1298 = vmatprep.subr.bf16.mxu1 %v1422_v29 }
  0x8b   : > { %1260 = vmatpush3.bf16.msra.mxu0 %v1416_v13 }
  0x8c   : > { %1261 = vmatprep.subr.bf16.mxu0 %v1418_v16 }
  0x8d   : > { %1299 = vmatpush3.bf16.msra.mxu1 %v1422_v29 }
  0x8e   : > { %1300 = vmatprep.subr.bf16.mxu1 %v1423_v30 }
  0x8f   : > { %1262 = vmatpush3.bf16.msra.mxu0 %v1419_v17 }
  0x91   : > { %1301 = vmatpush3.bf16.msra.mxu1 %v1423_v30 }
  0x92   : > { %843 = vmatmul.mubr.bf16.vlgmr.msra.gmra.mrb[8].mxu0 %v296_v22  ;;  %1302 = vmatprep.subr.bf16.mxu1 %v1424_v31 }
  0x93   : > { %850 = vmatprep.mubr.bf16.mxu0 %v304_v23 }
  0x95   : > { %1303 = vmatpush3.bf16.msra.mxu1 %v1424_v31 }
  0x96   : > { %1304 = vmatprep.subr.bf16.mxu1 %v1425_v32 }
  0x99   : > { %1305 = vmatpush3.bf16.msra.mxu1 %v1425_v32 }
  0x9a   : > { %851 = vmatmul.mubr.bf16.gmra.mrb[12].mxu0 %v303_v26  ;;  %1306 = vmatprep.subr.bf16.mxu1 %v1426_v33 }
  0x9d   : > { %1307 = vmatpush3.bf16.msra.mxu1 %v1426_v33 }
  0x9e   : > { %1308 = vmatprep.subr.bf16.mxu1 %v1427_v34 }
  0xa1   : > { %1309 = vmatpush3.bf16.msra.mxu1 %v1427_v34  ;;  %v1180_v34 = vld [vmem:[%s1771_s4] ss:$0 sm:$0xff] }
 0x145   : > { %v1207_v35 = vpop.f32.mrb[0].mxu0 }
 0x146   : > { %v1208_v37 = vpop.f32.mrb[1].mxu0 }
 0x147   : > { %v1209_v38 = vadd.f32 %v1208_v37, %v1207_v35  ;;  %v1210_v39 = vpop.f32.mrb[2].mxu0  ;;  %v1235_v40 = vpop.f32.mrb[0].mxu1 }
 0x148   : > { %v1211_v41 = vpop.f32.mrb[3].mxu0  ;;  %v1236_v44 = vpop.f32.mrb[1].mxu1 }
 0x149   : > { %v747_v42 = vadd.f32 %v1209_v38, %v1128_v36  ;;  %v1212_v43 = vadd.f32 %v1211_v41, %v1210_v39  ;;  %v1237_v45 = vadd.f32 %v1236_v44, %v1235_v40  ;;  %v1238_v46 = vpop.f32.mrb[2].mxu1 }
 0x14a   : > { %v1239_v48 = vpop.f32.mrb[3].mxu1 }
 0x14b   : > { %v750_v47 = vadd.f32 %v1212_v43, %v1128_v36  ;;  %v796_v49 = vadd.f32 %v1237_v45, %v747_v42  ;;  %v1240_v50 = vadd.f32 %v1239_v48, %v1238_v46 }
 0x14d   : > { %v799_v51 = vadd.f32 %v1240_v50, %v750_v47  ;;  %v1213_v52 = vpop.f32.mrb[4].mxu0 }
 0x14e   : > { %v1214_v53 = vpop.f32.mrb[5].mxu0 }
 0x14f   : > { %v1215_v54 = vadd.f32 %v1214_v53, %v1213_v52  ;;  %v1216_v55 = vpop.f32.mrb[6].mxu0  ;;  %v1241_v56 = vpop.f32.mrb[4].mxu1 }
 0x150   : > { %v1217_v57 = vpop.f32.mrb[7].mxu0  ;;  %v1242_v58 = vpop.f32.mrb[5].mxu1 }
 0x151   : > { %v755_v59 = vadd.f32 %v1215_v54, %v1128_v36  ;;  %v1218_v60 = vadd.f32 %v1217_v57, %v1216_v55  ;;  %v1243_v61 = vadd.f32 %v1242_v58, %v1241_v56  ;;  %v1244_v62 = vpop.f32.mrb[6].mxu1 }
 0x152   : > { %v1245_v63 = vpop.f32.mrb[7].mxu1 }
 0x153   : > { %v758_v0 = vadd.f32 %v1218_v60, %v1128_v36  ;;  %v804_v1 = vadd.f32 %v1243_v61, %v755_v59  ;;  %v1246_v2 = vadd.f32 %v1245_v63, %v1244_v62 }
 0x155   : > { %v807_v3 = vadd.f32 %v1246_v2, %v758_v0 }
 0x157   : > { %v1292_v4 = vpop.f32.mrb[8].mxu1 }
 0x158   : > { %v893_v5 = vpop.f32.mrb[9].mxu1 }
 0x159   : > { %v1293_v6 = vpop.f32.mrb[10].mxu1 }
 0x15a   : > { %v896_v7 = vpop.f32.mrb[11].mxu1 }
 0x165   : > { %v1263_v8 = vpop.f32.mrb[8].mxu0 }
 0x166   : > { %v1264_v9 = vpop.f32.mrb[9].mxu0 }
 0x167   : > { %v1265_v10 = vadd.f32 %v1264_v9, %v1263_v8  ;;  %v1266_v11 = vpop.f32.mrb[10].mxu0 }
 0x168   : > { %v1267_v12 = vpop.f32.mrb[11].mxu0 }
 0x169   : > { %v1268_v13 = vadd.f32 %v1267_v12, %v1266_v11  ;;  %v845_v14 = vadd.f32 %v1265_v10, %v796_v49 }
 0x16b   : > { %v894_v15 = vadd.f32 %v893_v5, %v845_v14  ;;  %v848_v16 = vadd.f32 %v1268_v13, %v799_v51 }
 0x16d   : > { %v897_v17 = vadd.f32 %v896_v7, %v848_v16  ;;  %v1269_v18 = vpop.f32.mrb[12].mxu0  ;;  %v908_v20 = vmax.f32 %v894_v15, 0.0 }
 0x16e   : > { %v1270_v19 = vpop.f32.mrb[13].mxu0 }
 0x16f   : > { %v909_v21 = vmax.f32 %v897_v17, 0.0  ;;  %v1271_v22 = vadd.f32 %v1270_v19, %v1269_v18  ;;  %v1272_v23 = vpop.f32.mrb[14].mxu0 }
 0x170   : > { %v1273_v24 = vpop.f32.mrb[15].mxu0 }
 0x171   : > { %v912_v25 = vpack.c.bf16 %v909_v21, %v908_v20  ;;  %v853_v26 = vadd.f32 %v1271_v22, %v804_v1  ;;  %v1274_v27 = vadd.f32 %v1273_v24, %v1272_v23 }
 0x173   : > { %v902_v28 = vadd.f32 %v1292_v4, %v853_v26  ;;  %v856_v29 = vadd.f32 %v1274_v27, %v807_v3  ;;  %1310 = vmatprep.mubr.bf16.mxu1 %v912_v25 }
 0x175   : > { %v905_v30 = vadd.f32 %v1293_v6, %v856_v29  ;;  %v910_v31 = vmax.f32 %v902_v28, 0.0 }
 0x177   : > { %v911_v32 = vmax.f32 %v905_v30, 0.0 }
 0x179   : > { %v913_v33 = vpack.c.bf16 %v911_v32, %v910_v31 }
 0x17b   : > { %1311 = vmatmul.mubr.bf16.vlgmr.msra.gmra.mrb[12].mxu1 %v913_v33 }
 0x24e   : > { %v1312_v35 = vpop.f32.mrb[12].mxu1 }
 0x24f   : > { %v1019_v36 = vpop.f32.mrb[13].mxu1  ;;  %v1028_v41 = vadd.f32 %v1312_v35, %v1180_v34 }
 0x250   : > { %v1020_v37 = vadd.f32 %v1180_v34, %v1019_v36  ;;  %v1313_v38 = vpop.f32.mrb[14].mxu1 }
 0x251   : > { %v1022_v39 = vpop.f32.mrb[15].mxu1  ;;  %v1031_v42 = vadd.f32 %v1313_v38, %v1180_v34  ;;  %1037 = vst.msk [vmem:[%s261_s6 + $0x10] sm:$0xff] %vm1034_vm1, %v1028_v41 }
 0x252   : > { %1035 = vst.msk [vmem:[%s261_s6] sm:$0xff] %vm1034_vm1, %v1020_v37  ;;  %v1023_v40 = vadd.f32 %v1180_v34, %v1022_v39 }
 0x253   : > { %1038 = vst.msk [vmem:[%s261_s6 + $0x18] sm:$0xff] %vm1034_vm1, %v1031_v42 }
 0x254   : > { %1036 = vst.msk [vmem:[%s261_s6 + $0x8] sm:$0xff] %vm1034_vm1, %v1023_v40 }
 0x255 PF: > { %p16_p6 = scmp.ge.s32.totalorder %s1609_s29, 4   ;;  %s1785_s18 = smov %s1516_s19 }
 0x256   : > { %s1786_s19 = smov %s1520_s20  ;;  %s1787_s20 = smov %s1635_s26 }
 0x257   : > { %s1788_s21 = smov %s1609_s29  ;;  %18 = sbr.rel (!%p16_p6) target bundleno = 4 (0x4), region = 84 }
 0x25e   :  { %1061 = vsyncpa [#allocation3], 1 }
 0x25f   :  { %1063 = vsyncpa [#allocation3 + $0x1], 1 }
 0x260   :  { %1064 = vsyncpa [#allocation5], 1 }

</bundles_post_ra>
